<compile_context>
chip_gen: v7x
topology: tpu7x:2x2x1
jax: 0.10.0
libtpu: 0.0.40
codegen_flags: <defaults>
</compile_context>

<pallas_src>
import math

import jax
import jax.numpy as jnp
from jax.experimental import pallas as pl
from jax.experimental.pallas import tpu as pltpu


def _sigmoid_via_tanh(x):
    # Single EUP tanh instead of exp + reciprocal (mathematically exact).
    return 0.5 * jnp.tanh(0.5 * x) + 0.5


def _char_lstm_kernel(tmax_ref, len_ref, gx_ref, whh_ref, b_ref, out_ref):
    """Whole packed-LSTM recurrence in one kernel invocation.

    tmax_ref : (1, 1)        int32  SMEM  max(lengths) -> dynamic trip count
    len_ref  : (Bp, 1)       int32  VMEM  per-row valid length (0 for pad rows)
    gx_ref   : (T*Bp, 4*Hp)  bf16   VMEM  per-step gate pre-activations
                                          (embedding x W_ih^T, gate-blocked,
                                          row = t*Bp + b, bias NOT included)
    whh_ref  : (Hp, 4*Hp)    bf16   VMEM  W_hh^T, gate-blocked, zero-padded
    b_ref    : (1,  4*Hp)    f32    VMEM  b_ih + b_hh, zero-padded
    out_ref  : (Bp, Hp)      f32    VMEM  final hidden state
    """
    Bp, Hp = out_ref.shape
    T = gx_ref.shape[0] // Bp

    # Hoisted (once, outside the serial loop):
    bias = b_ref[...]                                        # (1, 4Hp) f32
    len_b = jnp.broadcast_to(len_ref[...], (Bp, Hp))         # (Bp, Hp) int32
    t_end = jnp.minimum(tmax_ref[0, 0], T)                   # skip all-pad steps

    def step(t, carry):
        h, c = carry                                         # h bf16, c f32
        row = pl.multiple_of(t * Bp, Bp)                     # sublane-aligned
        gates = (gx_ref[pl.ds(row, Bp), :].astype(jnp.float32)
                 + bias
                 + jnp.dot(h, whh_ref[...],
                           preferred_element_type=jnp.float32))  # (Bp, 4Hp) f32
        # Hp is a multiple of 128 -> gate slices are lane-tile aligned.
        i_g = _sigmoid_via_tanh(gates[:, 0 * Hp:1 * Hp])
        f_g = _sigmoid_via_tanh(gates[:, 1 * Hp:2 * Hp])
        g_g = jnp.tanh(gates[:, 2 * Hp:3 * Hp])
        o_g = _sigmoid_via_tanh(gates[:, 3 * Hp:4 * Hp])
        c_new = f_g * c + i_g * g_g
        h_new = (o_g * jnp.tanh(c_new)).astype(jnp.bfloat16)
        # packed-sequence semantics: only advance state while t < length[b]
        valid = t < len_b                                    # reused mask
        return jnp.where(valid, h_new, h), jnp.where(valid, c_new, c)

    h0 = jnp.zeros((Bp, Hp), jnp.bfloat16)
    c0 = jnp.zeros((Bp, Hp), jnp.float32)
    # Dynamic trip count (max length) -> no static unroll factor here.
    h_fin, _ = jax.lax.fori_loop(0, t_end, step, (h0, c0))
    out_ref[...] = h_fin.astype(out_ref.dtype)


def _round_up(n, m):
    return ((n + m - 1) // m) * m


def _pad_gate_blocks(a, h, hp):
    """Pad a gate-blocked leading axis of size 4*h (PyTorch order i,f,g,o) to
    4*hp, zero-padding each gate block independently."""
    pads = [(0, hp - h)] + [(0, 0)] * (a.ndim - 1)
    blocks = [jnp.pad(a[g * h:(g + 1) * h], pads) for g in range(4)]
    return jnp.concatenate(blocks, axis=0)


def _nbytes(shape, dtype):
    return math.prod(shape) * jnp.dtype(dtype).itemsize


def _vmem_limit_bytes(needed):
    """Size the VMEM budget from the actual working set, capped per chip."""
    try:
        cap = int(getattr(pltpu.get_tpu_info(), "vmem_capacity_bytes",
                          128 * 1024 * 1024))
    except Exception:  # pragma: no cover - conservative fallback
        cap = 128 * 1024 * 1024
    ceiling = (cap * 3) // 4            # leave Mosaic scratch headroom
    want = max(2 * needed + (4 << 20), 32 << 20)
    return min(want, ceiling)


def character_lstm_forward(sentence, lengths, embed_table, w_ih, w_hh, b_ih,
                           b_hh, *, compute_dtype=jnp.bfloat16):
    """sentence: [B, T] int32; lengths: [B] int32 (pack_padded_sequence order).
    Returns hn of shape [B, hidden_dim] (float32)."""
    B, T = sentence.shape
    H = w_hh.shape[1]
    Bp = _round_up(B, 8)      # sublane multiple
    Hp = _round_up(H, 128)    # lane multiple

    # ---- glue (plain JAX): fused embedding x W_ih gather + layout/padding ----
    # TODO(synk): the per-token gather (dynamic row lookup) is left to XLA; a
    # Pallas version would need per-token DMA gather, not worth it at this size.
    # Padded hidden/gate units get zero weights & bias: their preactivation is
    # 0, so c stays 0 and h stays 0 -> they never contaminate real units.
    w_ih_pad = _pad_gate_blocks(w_ih, H, Hp)                          # (4Hp, E)
    proj_table = jnp.dot(embed_table, w_ih_pad.T)                     # (V, 4Hp) f32
    gx = jnp.take(proj_table, sentence, axis=0)                       # (B, T, 4Hp)
    gx = jnp.transpose(gx, (1, 0, 2))                                 # (T, B, 4Hp)
    gx = jnp.pad(gx, ((0, 0), (0, Bp - B), (0, 0)))                   # (T, Bp, 4Hp)
    gx2d = gx.reshape(T * Bp, 4 * Hp).astype(compute_dtype)           # row = t*Bp+b

    # Padded batch rows get length 0 -> their state stays zero forever.
    len_col = jnp.pad(lengths.astype(jnp.int32), (0, Bp - B)).reshape(Bp, 1)
    # Dynamic recurrence bound: steps past max(lengths) are all-frozen, skip.
    tmax = jnp.minimum(jnp.max(lengths).astype(jnp.int32), T).reshape(1, 1)

    # Recurrent weights: PyTorch (4H, H) -> transposed + gate-block zero-padded.
    w_hh_in = jnp.pad(w_hh, ((0, 0), (0, Hp - H)))                    # (4H, Hp)
    w_hh_t = _pad_gate_blocks(w_hh_in, H, Hp).T.astype(compute_dtype)  # (Hp, 4Hp)
    bias = _pad_gate_blocks(b_ih + b_hh, H, Hp).reshape(1, 4 * Hp)
    bias = bias.astype(jnp.float32)

    needed = (_nbytes((T * Bp, 4 * Hp), compute_dtype)   # gx (dominant)
              + _nbytes((Hp, 4 * Hp), compute_dtype)     # W_hh^T
              + _nbytes((1, 128 * pl.cdiv(4 * Hp, 128)), jnp.float32)  # bias
              + _nbytes((Bp, 128), jnp.int32)            # lengths (lane-padded)
              + _nbytes((Bp, Hp), jnp.float32))          # output

    smem = pl.BlockSpec(memory_space=pltpu.MemorySpace.SMEM)
    vmem = pl.BlockSpec(memory_space=pltpu.MemorySpace.VMEM)
    out = pl.pallas_call(
        _char_lstm_kernel,
        out_shape=jax.ShapeDtypeStruct((Bp, Hp), jnp.float32),
        in_specs=[smem, vmem, vmem, vmem, vmem],
        out_specs=vmem,
        compiler_params=pltpu.CompilerParams(
            vmem_limit_bytes=_vmem_limit_bytes(needed)),
    )(tmax, len_col, gx2d, w_hh_t, bias)

    return out[:B, :H]


def _reference_forward(sentence, lengths, embed_table, w_ih, w_hh, b_ih, b_hh,
                       *, mirror_kernel_precision=True):
    """Pure-JAX reference. With mirror_kernel_precision=True it follows the
    kernel's precision policy exactly (f32 input projection rounded to bf16,
    bf16 recurrent matmul operands / h carry, f32 gate math and c); otherwise
    it is full f32 (semantic ground truth)."""
    B, T = sentence.shape
    H = w_hh.shape[1]
    proj = jnp.dot(embed_table, w_ih.T)                 # (V, 4H) f32
    gx_all = jnp.take(proj, sentence, axis=0)           # (B, T, 4H)
    if mirror_kernel_precision:
        gx_all = gx_all.astype(jnp.bfloat16)
        whh_t = w_hh.T.astype(jnp.bfloat16)
        h_dtype = jnp.bfloat16
        sig = _sigmoid_via_tanh
    else:
        whh_t = w_hh.T
        h_dtype = jnp.float32
        sig = jax.nn.sigmoid
    bias = (b_ih + b_hh).astype(jnp.float32)
    h = jnp.zeros((B, H), h_dtype)
    c = jnp.zeros((B, H), jnp.float32)
    for t in range(T):
        gates = (gx_all[:, t, :].astype(jnp.float32) + bias
                 + jnp.dot(h.astype(whh_t.dtype), whh_t,
                           preferred_element_type=jnp.float32))
        i_g = sig(gates[:, 0 * H:1 * H])
        f_g = sig(gates[:, 1 * H:2 * H])
        g_g = jnp.tanh(gates[:, 2 * H:3 * H])
        o_g = sig(gates[:, 3 * H:4 * H])
        c_new = f_g * c + i_g * g_g
        h_new = (o_g * jnp.tanh(c_new)).astype(h_dtype)
        valid = (t < lengths)[:, None]
        h = jnp.where(valid, h_new, h)
        c = jnp.where(valid, c_new, c)
    return h.astype(jnp.float32)


if __name__ == "__main__":
    # Small, deterministic config
    vocab_size, embed_dim, hidden_dim = 20, 16, 32
    B, T = 2, 8

    key = jax.random.PRNGKey(0)
    k_emb, k_wih, k_whh, k_bih, k_bhh, k_tok = jax.random.split(key, 6)

    # PyTorch-style uniform(-1/sqrt(H), 1/sqrt(H)) init
    bound = 1.0 / jnp.sqrt(jnp.float32(hidden_dim))
    embed_table = jax.random.normal(k_emb, (vocab_size, embed_dim), jnp.float32)
    w_ih = jax.random.uniform(k_wih, (4 * hidden_dim, embed_dim), jnp.float32,
                              -bound, bound)
    w_hh = jax.random.uniform(k_whh, (4 * hidden_dim, hidden_dim), jnp.float32,
                              -bound, bound)
    b_ih = jax.random.uniform(k_bih, (4 * hidden_dim,), jnp.float32, -bound, bound)
    b_hh = jax.random.uniform(k_bhh, (4 * hidden_dim,), jnp.float32, -bound, bound)

    # Inputs: token ids [B, T]; lengths sorted descending (pack_padded_sequence)
    sentence = jax.random.randint(k_tok, (B, T), 0, vocab_size, jnp.int32)
    lengths = jnp.array([8, 5], dtype=jnp.int32)

    hn = jax.jit(character_lstm_forward)(sentence, lengths, embed_table,
                                         w_ih, w_hh, b_ih, b_hh)
    hn = jax.block_until_ready(hn)
    assert hn.shape == (B, hidden_dim)

    # Matched-precision reference (mirrors the kernel's bf16/f32 policy).
    ref_match = _reference_forward(sentence, lengths, embed_table, w_ih, w_hh,
                                   b_ih, b_hh, mirror_kernel_precision=True)
    # Full-f32 reference (bounds the bf16 quantization error).
    ref_f32 = _reference_forward(sentence, lengths, embed_table, w_ih, w_hh,
                                 b_ih, b_hh, mirror_kernel_precision=False)

    assert jnp.allclose(hn, ref_match, atol=2e-2, rtol=2e-2), \
        float(jnp.max(jnp.abs(hn - ref_match)))
    assert jnp.allclose(hn, ref_f32, atol=5e-2, rtol=5e-2), \
        float(jnp.max(jnp.abs(hn - ref_f32)))

    print("KERNEL_OK")
</pallas_src>

<mosaic_0001>
module attributes {stable_mosaic.version = 11 : i64} {
  func.func @_char_lstm_kernel(%arg0: memref<1x1xi32, #tpu.memory_space<smem>>, %arg1: memref<8x1xi32, #tpu.memory_space<vmem>>, %arg2: memref<64x512xbf16, #tpu.memory_space<vmem>>, %arg3: memref<128x512xbf16, #tpu.memory_space<vmem>>, %arg4: memref<1x512xf32, #tpu.memory_space<vmem>>, %arg5: memref<8x128xf32, #tpu.memory_space<vmem>>) attributes {dimension_semantics = [], scalar_prefetch = 0 : i64, scratch_operands = 0 : i64, tpu.core_type = #tpu.core_type<tc>} {
    %c0 = arith.constant 0 : index
    %c0_0 = arith.constant 0 : index
    %0 = vector.load %arg4[%c0, %c0_0] : memref<1x512xf32, #tpu.memory_space<vmem>>, vector<1x512xf32>
    %c0_1 = arith.constant 0 : index
    %c0_2 = arith.constant 0 : index
    %1 = vector.load %arg1[%c0_1, %c0_2] : memref<8x1xi32, #tpu.memory_space<vmem>>, vector<8x1xi32>
    %2 = vector.shape_cast %1 : vector<8x1xi32> to vector<8x1xi32>
    %3 = vector.broadcast %2 : vector<8x1xi32> to vector<8x128xi32>
    %c0_3 = arith.constant 0 : index
    %c0_4 = arith.constant 0 : index
    %4 = memref.load %arg0[%c0_3, %c0_4] : memref<1x1xi32, #tpu.memory_space<smem>>
    %c8_i32 = arith.constant 8 : i32
    %5 = arith.minsi %4, %c8_i32 : i32
    %cst = arith.constant 0.000000e+00 : bf16
    %6 = vector.broadcast %cst : bf16 to vector<8x128xbf16>
    %cst_5 = arith.constant 0.000000e+00 : f32
    %7 = vector.broadcast %cst_5 : f32 to vector<8x128xf32>
    %c0_i32 = arith.constant 0 : i32
    %8 = arith.subi %5, %c0_i32 : i32
    %9 = arith.addi %c0_i32, %8 : i32
    %c1_i32 = arith.constant 1 : i32
    %10:2 = scf.for %arg6 = %c0_i32 to %9 step %c1_i32 iter_args(%arg7 = %6, %arg8 = %7) -> (vector<8x128xbf16>, vector<8x128xf32>)  : i32 {
      %c8_i32_8 = arith.constant 8 : i32
      %13 = arith.muli %arg6, %c8_i32_8 : i32
      %14 = tpu.assume_multiple %13, 8 : i32
      %15 = arith.index_cast %14 : i32 to index
      %c0_9 = arith.constant 0 : index
      %16 = vector.load %arg2[%15, %c0_9] : memref<64x512xbf16, #tpu.memory_space<vmem>>, vector<8x512xbf16>
      %17 = arith.extf %16 : vector<8x512xbf16> to vector<8x512xf32>
      %18 = vector.broadcast %0 : vector<1x512xf32> to vector<8x512xf32>
      %19 = arith.addf %17, %18 : vector<8x512xf32>
      %c0_10 = arith.constant 0 : index
      %c0_11 = arith.constant 0 : index
      %20 = vector.load %arg3[%c0_10, %c0_11] : memref<128x512xbf16, #tpu.memory_space<vmem>>, vector<128x512xbf16>
      %cst_12 = arith.constant dense<0.000000e+00> : vector<8x512xf32>
      %21 = tpu.matmul %arg7, %20, %cst_12 {dimension_numbers = #tpu.dot_dimension_numbers<[1], [0], [0], [1], [0, 0, 1, 1], [], []>} : vector<8x128xbf16>, vector<128x512xbf16>, vector<8x512xf32> -> vector<8x512xf32>
      %22 = arith.addf %19, %21 : vector<8x512xf32>
      %23 = vector.extract_strided_slice %22 {offsets = [0, 0], sizes = [8, 128], strides = [1, 1]} : vector<8x512xf32> to vector<8x128xf32>
      %cst_13 = arith.constant 5.000000e-01 : f32
      %24 = vector.broadcast %cst_13 : f32 to vector<8x128xf32>
      %25 = arith.mulf %24, %23 : vector<8x128xf32>
      %26 = math.tanh %25 : vector<8x128xf32>
      %cst_14 = arith.constant 5.000000e-01 : f32
      %27 = vector.broadcast %cst_14 : f32 to vector<8x128xf32>
      %28 = arith.mulf %27, %26 : vector<8x128xf32>
      %cst_15 = arith.constant 5.000000e-01 : f32
      %29 = vector.broadcast %cst_15 : f32 to vector<8x128xf32>
      %30 = arith.addf %28, %29 : vector<8x128xf32>
      %31 = vector.extract_strided_slice %22 {offsets = [0, 128], sizes = [8, 128], strides = [1, 1]} : vector<8x512xf32> to vector<8x128xf32>
      %cst_16 = arith.constant 5.000000e-01 : f32
      %32 = vector.broadcast %cst_16 : f32 to vector<8x128xf32>
      %33 = arith.mulf %32, %31 : vector<8x128xf32>
      %34 = math.tanh %33 : vector<8x128xf32>
      %cst_17 = arith.constant 5.000000e-01 : f32
      %35 = vector.broadcast %cst_17 : f32 to vector<8x128xf32>
      %36 = arith.mulf %35, %34 : vector<8x128xf32>
      %cst_18 = arith.constant 5.000000e-01 : f32
      %37 = vector.broadcast %cst_18 : f32 to vector<8x128xf32>
      %38 = arith.addf %36, %37 : vector<8x128xf32>
      %39 = vector.extract_strided_slice %22 {offsets = [0, 256], sizes = [8, 128], strides = [1, 1]} : vector<8x512xf32> to vector<8x128xf32>
      %40 = math.tanh %39 : vector<8x128xf32>
      %41 = vector.extract_strided_slice %22 {offsets = [0, 384], sizes = [8, 128], strides = [1, 1]} : vector<8x512xf32> to vector<8x128xf32>
      %cst_19 = arith.constant 5.000000e-01 : f32
      %42 = vector.broadcast %cst_19 : f32 to vector<8x128xf32>
      %43 = arith.mulf %42, %41 : vector<8x128xf32>
      %44 = math.tanh %43 : vector<8x128xf32>
      %cst_20 = arith.constant 5.000000e-01 : f32
      %45 = vector.broadcast %cst_20 : f32 to vector<8x128xf32>
      %46 = arith.mulf %45, %44 : vector<8x128xf32>
      %cst_21 = arith.constant 5.000000e-01 : f32
      %47 = vector.broadcast %cst_21 : f32 to vector<8x128xf32>
      %48 = arith.addf %46, %47 : vector<8x128xf32>
      %49 = arith.mulf %38, %arg8 : vector<8x128xf32>
      %50 = arith.mulf %30, %40 : vector<8x128xf32>
      %51 = arith.addf %49, %50 : vector<8x128xf32>
      %52 = math.tanh %51 : vector<8x128xf32>
      %53 = arith.mulf %48, %52 : vector<8x128xf32>
      %54 = arith.truncf %53 : vector<8x128xf32> to vector<8x128xbf16>
      %55 = vector.broadcast %arg6 : i32 to vector<8x128xi32>
      %56 = arith.cmpi slt, %55, %3 : vector<8x128xi32>
      %57 = arith.select %56, %54, %arg7 : vector<8x128xi1>, vector<8x128xbf16>
      %58 = arith.select %56, %51, %arg8 : vector<8x128xi1>, vector<8x128xf32>
      scf.yield %57, %58 : vector<8x128xbf16>, vector<8x128xf32>
    }
    %11 = arith.extf %10#0 : vector<8x128xbf16> to vector<8x128xf32>
    %c0_6 = arith.constant 0 : index
    %c0_7 = arith.constant 0 : index
    %12 = vector.load %arg5[%c0_6, %c0_7] : memref<8x128xf32, #tpu.memory_space<vmem>>, vector<8x128xf32>
    tpu.vector_store %arg5[%c0_6, %c0_7], %11 {strides = array<i32>} : memref<8x128xf32, #tpu.memory_space<vmem>>, vector<8x128xf32>,
    return
  }
}

</mosaic_0001>

<bundles_post_ra>
// kernel: character_lstm_forward.1
= control target key start
LH: loop header
LB: loop body
LE: loop exit
PB: predicated region body
PF: predicated region fallthrough
CT: control target
= control target key end

     0   :  { %v561_v0 = vmov 0   ;;  %v614_v4 = vmov 0   ;;  %s756_s1 = inlined_call_operand.vmem [shape: s32[8,1], index: 1, kind: input, shape index: {}]   ;;  %s757_s0 = inlined_call_operand.<no memory space> [shape: s32[1,1], index: 0, kind: input, shape index: {}]   ;;  %s758_s4 = inlined_call_operand.vmem [shape: f32[1,512], index: 4, kind: input, shape index: {}]   ;;  %s759_s2 = inlined_call_operand.vmem [shape: bf16[64,512], index: 2, kind: input, shape index: {}]   ;;  %s760_s3 = inlined_call_operand.vmem [shape: bf16[128,512], index: 3, kind: input, shape index: {}]   ;;  %s761_s5 = inlined_call_operand.vmem [shape: f32[8,128], index: 5, kind: output, shape index: {}]  }
   0x1   :  { %470 = vset.pattern.permute.xlu0 %v561_v0  ;;  %v23_v1 = vld [vmem:[%s756_s1] sm:$0xff]  ;;  %p28_p0 = scmp.lt.s32.totalorder %s757_s0, 8  ;;  %p432_p1 = scmp.le.s32.totalorder %s757_s0, 0 }
   0x2   :  { %v599_v2 = vld [vmem:[%s758_s4] sm:$0xf]  ;;  %25 = vperm.xlu0 %470, %v23_v1   ;;  %v616_v5 = vmov (!%p432_p1), 0.0   ;;  %v618_v6 = vmov (!%p432_p1), 0   ;;  %s620_s1 = smov (!%p432_p1), 0  }
   0x3   :  { %s607_s26 = scalar_select %p28_p0, %s757_s0, 8 }
  0x7b   :  { %389 = sbr.rel (%p432_p1) target bundleno = 417 (0x1a1), region = 42 }
  0x81   :  { %v609_v3 = vpop.permute.xlu0 %25 }
  0x82 LB: > { %v471_v7 = vld [vmem:[%s760_s3 + $0x4] ss:$16 sps:$4 sm:$0xff]   ;;  %v473_v8 = vld [vmem:[%s760_s3] ss:$16 sps:$4 sm:$0xff]   ;;  %v562_v9 = vmov 0   ;;  %s397_s14 = sshll.u32 %s555_s1, 3  ;;  %v51_v40 = vlaneseq  ;;  %s555_s1 = sphi %s620_s1, %s33_s1   ;;  %v551_v6 = vphi %v618_v6, %v762_v6   ;;  %v547_v5 = vphi %v616_v5, %v376_v5  }
  0x83   : > { %299 = vmatprep.mubr.bf16.mxu0 %v562_v9  ;;  %340 = vmatprep.mubr.bf16.mxu1 %v562_v9  ;;  %v474_v10 = vld [vmem:[%s760_s3 + $0x24] ss:$16 sps:$4 sm:$0xff]   ;;  %v476_v11 = vld [vmem:[%s760_s3 + $0xc] ss:$16 sps:$4 sm:$0xff]   ;;  %v478_v12 = vld [vmem:[%s760_s3 + $0x20] ss:$16 sps:$4 sm:$0xff]  }
  0x84   : > { %267 = vmatprep.subr.bf16.mxu0 %v471_v7  ;;  %v479_v13 = vld [vmem:[%s760_s3 + $0x8] ss:$16 sps:$4 sm:$0xff]   ;;  %v480_v14 = vld [vmem:[%s760_s3 + $0x44] ss:$16 sps:$4 sm:$0xff]   ;;  %308 = vmatprep.subr.bf16.mxu1 %v476_v11  ;;  %v482_v15 = vld [vmem:[%s760_s3 + $0x2c] ss:$16 sps:$4 sm:$0xff]  }
  0x85   : > { %268 = vmatpush1.bf16.msra.mxu0 %v473_v8  ;;  %309 = vmatpush1.bf16.msra.mxu1 %v479_v13  ;;  %v485_v16 = vld [vmem:[%s760_s3 + $0x28] ss:$16 sps:$4 sm:$0xff]   ;;  %v484_v17 = vld [vmem:[%s760_s3 + $0x40] ss:$16 sps:$4 sm:$0xff]   ;;  %v486_v18 = vld [vmem:[%s760_s3 + $0x64] ss:$16 sps:$4 sm:$0xff]  }
  0x86   : > { %269 = vmatprep.subr.bf16.mxu0 %v474_v10  ;;  %310 = vmatprep.subr.bf16.mxu1 %v482_v15  ;;  %v488_v19 = vld [vmem:[%s760_s3 + $0x4c] ss:$16 sps:$4 sm:$0xff]   ;;  %v491_v20 = vld [vmem:[%s760_s3 + $0x48] ss:$16 sps:$4 sm:$0xff]   ;;  %v490_v21 = vld [vmem:[%s760_s3 + $0x60] ss:$16 sps:$4 sm:$0xff]  }
  0x87   : > { %v494_v22 = vld [vmem:[%s760_s3 + $0x6c] ss:$16 sps:$4 sm:$0xff]   ;;  %v492_v23 = vld [vmem:[%s760_s3 + $0x84] ss:$16 sps:$4 sm:$0xff]   ;;  %v496_v24 = vld [vmem:[%s760_s3 + $0x80] ss:$16 sps:$4 sm:$0xff]  }
  0x88   : > { %v497_v25 = vld [vmem:[%s760_s3 + $0x68] ss:$16 sps:$4 sm:$0xff]   ;;  %v500_v26 = vld [vmem:[%s760_s3 + $0x8c] ss:$16 sps:$4 sm:$0xff]   ;;  %v498_v27 = vld [vmem:[%s760_s3 + $0xa4] ss:$16 sps:$4 sm:$0xff]  }
  0x89   : > { %270 = vmatpush1.bf16.msra.mxu0 %v478_v12  ;;  %311 = vmatpush1.bf16.msra.mxu1 %v485_v16  ;;  %v503_v28 = vld [vmem:[%s760_s3 + $0x88] ss:$16 sps:$4 sm:$0xff]   ;;  %v502_v29 = vld [vmem:[%s760_s3 + $0xa0] ss:$16 sps:$4 sm:$0xff]   ;;  %v506_v30 = vld [vmem:[%s760_s3 + $0xac] ss:$16 sps:$4 sm:$0xff]  }
  0x8a   : > { %271 = vmatprep.subr.bf16.mxu0 %v480_v14  ;;  %312 = vmatprep.subr.bf16.mxu1 %v488_v19  ;;  %v504_v31 = vld [vmem:[%s760_s3 + $0xc4] ss:$16 sps:$4 sm:$0xff]   ;;  %v509_v32 = vld [vmem:[%s760_s3 + $0xa8] ss:$16 sps:$4 sm:$0xff]   ;;  %v508_v33 = vld [vmem:[%s760_s3 + $0xc0] ss:$16 sps:$4 sm:$0xff]  }
  0x8b   : > { %v512_v34 = vld [vmem:[%s760_s3 + $0xcc] ss:$16 sps:$4 sm:$0xff]   ;;  %v510_v35 = vld [vmem:[%s760_s3 + $0xe4] ss:$16 sps:$4 sm:$0xff]   ;;  %v515_v36 = vld [vmem:[%s760_s3 + $0xc8] ss:$16 sps:$4 sm:$0xff]  }
  0x8c   : > { %v514_v37 = vld [vmem:[%s760_s3 + $0xe0] ss:$16 sps:$4 sm:$0xff]   ;;  %v516_v38 = vld [vmem:[%s760_s3 + $0xec] ss:$16 sps:$4 sm:$0xff]   ;;  %v518_v39 = vld [vmem:[%s760_s3 + $0xe8] ss:$16 sps:$4 sm:$0xff]  }
  0x8d   : > { %272 = vmatpush1.bf16.msra.mxu0 %v484_v17  ;;  %313 = vmatpush1.bf16.msra.mxu1 %v491_v20  ;;  %s39_s15 = sshra.s32 %s397_s14, 3  ;;  %v52_v41 = vshrl.u32 %v51_v40, 7 }
  0x8e   : > { %273 = vmatprep.subr.bf16.mxu0 %v486_v18  ;;  %314 = vmatprep.subr.bf16.mxu1 %v494_v22  ;;  %s435_s16 = sshll.u32 %s39_s15, 4 }
  0x8f   : > { %s43_s19 = scalar_lea.vmem %s759_s2, %s435_s16  ;;  %v53_v42 = vsub.s32 0, %v52_v41  ;;  %v57_v44 = vsub.s32 1, %v52_v41  ;;  %v61_v45 = vsub.s32 2, %v52_v41  ;;  %v65_v54 = vsub.s32 3, %v52_v41 }
  0x90   : > { %v44_v43 = vld [vmem:[%s43_s19] sm:$0xff]  ;;  %v45_v48 = vld [vmem:[%s43_s19 + $0x8] sm:$0xff] }
  0x91   : > { %274 = vmatpush1.bf16.msra.mxu0 %v490_v21  ;;  %315 = vmatpush1.bf16.msra.mxu1 %v497_v25  ;;  %v46_v46 = vunpack.c.l.bf16 %v44_v43  ;;  %v54_v47 = vrot.slane %v599_v2, %v53_v42  ;;  %v47_v49 = vunpack.c.h.bf16 %v44_v43  ;;  %v58_v50 = vrot.slane %v599_v2, %v57_v44 }
  0x92   : > { %275 = vmatprep.subr.bf16.mxu0 %v492_v23  ;;  %316 = vmatprep.subr.bf16.mxu1 %v500_v26  ;;  %v48_v51 = vunpack.c.l.bf16 %v45_v48  ;;  %v62_v52 = vrot.slane %v599_v2, %v61_v45  ;;  %v49_v60 = vunpack.c.h.bf16 %v45_v48  ;;  %v66_v61 = vrot.slane %v599_v2, %v65_v54 }
  0x93   : > { %v71_v53 = vadd.f32 %v54_v47, %v46_v46  ;;  %v72_v55 = vadd.f32 %v58_v50, %v47_v49  ;;  %v372_v21 = vstv %s555_s1  ;;  %s33_s1 = sadd.s32 1, %s555_s1  }
  0x94   : > { %v73_v57 = vadd.f32 %v62_v52, %v48_v51  ;;  %v74_v10 = vadd.f32 %v66_v61, %v49_v60  ;;  %vm373_vm0 = vcmp.lt.s32.totalorder %v372_v21, %v609_v3  ;;  %p32_p2 = scmp.ge.s32.totalorder %s33_s1, %s607_s26 }
  0x95   : > { %276 = vmatpush1.bf16.msra.mxu0 %v496_v24  ;;  %317 = vmatpush1.bf16.msra.mxu1 %v503_v28  ;;  %vm374_vm1 = vmpackc.low %vm373_vm0, %vm373_vm0 }
  0x96   : > { %277 = vmatprep.subr.bf16.mxu0 %v498_v27  ;;  %318 = vmatprep.subr.bf16.mxu1 %v506_v30 }
  0x99   : > { %278 = vmatpush1.bf16.msra.mxu0 %v502_v29  ;;  %319 = vmatpush1.bf16.msra.mxu1 %v509_v32 }
  0x9a   : > { %279 = vmatprep.subr.bf16.mxu0 %v504_v31  ;;  %320 = vmatprep.subr.bf16.mxu1 %v512_v34 }
  0x9d   : > { %280 = vmatpush1.bf16.msra.mxu0 %v508_v33  ;;  %321 = vmatpush1.bf16.msra.mxu1 %v515_v36 }
  0x9e   : > { %281 = vmatprep.subr.bf16.mxu0 %v510_v35  ;;  %322 = vmatprep.subr.bf16.mxu1 %v516_v38 }
  0xa1   : > { %282 = vmatpush1.bf16.msra.mxu0 %v514_v37  ;;  %323 = vmatpush1.bf16.msra.mxu1 %v518_v39 }
  0xa4   : > { %300 = vmatmul.mubr.bf16.vlgmr.msra.gmra.mrb[0].mxu0 %v551_v6  ;;  %341 = vmatmul.mubr.bf16.vlgmr.msra.gmra.mrb[0].mxu1 %v551_v6 }
 0x177   : > { %v301_v56 = vpop.f32.mrb[0].mxu0  ;;  %v342_v4 = vpop.f32.mrb[0].mxu1 }
 0x178   : > { %v349_v58 = vadd.f32 %v301_v56, %v71_v53  ;;  %v303_v59 = vpop.f32.mrb[1].mxu0  ;;  %v351_v8 = vadd.f32 %v342_v4, %v73_v57  ;;  %v344_v9 = vpop.f32.mrb[1].mxu1 }
 0x179   : > { %v350_v62 = vadd.f32 %v303_v59, %v72_v55  ;;  %v305_v63 = vpop.f32.mrb[2].mxu0  ;;  %v346_v11 = vpop.f32.mrb[2].mxu1  ;;  %v352_v13 = vadd.f32 %v344_v9, %v74_v10 }
 0x17a   : > { %v353_v0 = vmul.f32 0.5, %v349_v58  ;;  %v306_v1 = vpop.f32.mrb[3].mxu0  ;;  %v347_v12 = vpop.f32.mrb[3].mxu1 }
 0x17b   : > { %v357_v7 = vmul.f32 0.5, %v350_v62  ;;  %v362_v14 = vmul.f32 0.5, %v352_v13 }
 0x17c   : > { %519 = vtanh.f32 %v353_v0 }
 0x17d   : > { %521 = vtanh.f32 %v357_v7 }
 0x17e   : > { %523 = vtanh.f32 %v351_v8 }
 0x17f   : > { %525 = vtanh.f32 %v362_v14 }
 0x186   : > { %v520_v15 = vpop.eup %519 }
 0x187   : > { %v522_v16 = vpop.eup %521  ;;  %v355_v17 = vmul.f32 0.5, %v520_v15 }
 0x188   : > { %v524_v18 = vpop.eup %523  ;;  %v359_v19 = vmul.f32 0.5, %v522_v16 }
 0x189   : > { %v356_v20 = vadd.f32 0.5, %v355_v17  ;;  %v526_v26 = vpop.eup %525 }
 0x18a   : > { %v360_v22 = vadd.f32 0.5, %v359_v19  ;;  %v364_v27 = vmul.f32 0.5, %v526_v26 }
 0x18b   : > { %v367_v23 = vmul.f32 %v524_v18, %v356_v20 }
 0x18c   : > { %v366_v24 = vmul.f32 %v547_v5, %v360_v22  ;;  %v365_v28 = vadd.f32 0.5, %v364_v27 }
 0x18e   : > { %v368_v25 = vadd.f32 %v367_v23, %v366_v24 }
 0x190   : > { %527 = vtanh.f32 %v368_v25  ;;  %v376_v5 = vsel %vm373_vm0, %v368_v25, %v547_v5  }
 0x19a   : > { %v528_v29 = vpop.eup %527  ;;  %35 = sbr.rel (!%p32_p2) target bundleno = 130 (0x82), region = 48 }
 0x19b   : > { %v370_v30 = vmul.f32 %v528_v29, %v365_v28 }
 0x19d   : > { %v371_v31 = vpack.c.bf16 %v370_v30, %v370_v30 }
 0x19f   : > { %v375_v32 = vsel %vm374_vm1, %v371_v31, %v551_v6  }
 0x1a0   : > { %v762_v6 = vmov %v375_v32  ;;  %v763_v4 = vmov (%p32_p2), %v375_v32 }
 0x1a1 PF:  { %v377_v33 = vunpack.c.l.bf16 %v559_v4  ;;  %v559_v4 = vphi %v614_v4, %v763_v4  }
 0x1a3   :  { %378 = vst [vmem:[%s761_s5] sm:$0xff] %v377_v33 }

</bundles_post_ra>
